<compile_context>
chip_gen: v7x
topology: tpu7x:2x2x1
jax: 0.10.0
libtpu: 0.0.40
codegen_flags: <defaults>
</compile_context>

<pallas_src>
import functools

import jax
import jax.numpy as jnp
from jax.experimental import pallas as pl
from jax.experimental.pallas import tpu as pltpu

NUM_H3 = 100   # input features
NUM_H2 = 512   # output features


def _linear_kernel(x_ref, wt_ref, b_ref, o_ref):
    # x_ref: (TB, 100), wt_ref: (100, 512), b_ref: (1, 512), o_ref: (TB, 512)
    x = x_ref[...].astype(jnp.float32)          # mirrors x.float(); no-op for f32 input
    acc = jnp.dot(x, wt_ref[...], preferred_element_type=jnp.float32)
    o_ref[...] = (acc + b_ref[...]).astype(o_ref.dtype)


def _round_up(n, m):
    return ((n + m - 1) // m) * m


@functools.partial(jax.jit, static_argnames=("block_b", "out_dtype"))
def backward_h3_h2_forward(x, wt, b, *, block_b=2048, out_dtype=jnp.float32):
    """y = x @ wt + b  (equivalent of nn.Linear(100, 512) on x.float())."""
    B = x.shape[0]
    wt = wt.astype(jnp.float32)
    b2d = b.astype(jnp.float32).reshape(1, NUM_H2)

    # Batch tile:
    #  - tiny batch: one step (block == full dim is always legal; overhead moot)
    #  - otherwise: multiple of 8, capped at block_b, and sized so the grid has
    #    >= 2 steps (lets v7x megacore split the work across TensorCores).
    if B <= 512:
        tb = B
    else:
        tb = min(block_b, _round_up(pl.cdiv(B, 2), 8))
    grid = (pl.cdiv(B, tb),)

    x_bytes = B * NUM_H3 * x.dtype.itemsize
    y_bytes = B * NUM_H2 * jnp.dtype(out_dtype).itemsize
    w_bytes = (NUM_H3 * NUM_H2 + NUM_H2) * 4
    cost = pl.CostEstimate(
        flops=2 * B * NUM_H3 * NUM_H2,
        transcendentals=0,
        bytes_accessed=x_bytes + y_bytes + w_bytes,
    )

    return pl.pallas_call(
        _linear_kernel,
        out_shape=jax.ShapeDtypeStruct((B, NUM_H2), out_dtype),
        grid_spec=pltpu.PrefetchScalarGridSpec(
            num_scalar_prefetch=0,
            grid=grid,
            in_specs=[
                # x: tiled along batch, fed at K=100 (full last dim -> legal).
                pl.BlockSpec((tb, NUM_H3), lambda i: (i, 0)),
                # weights / bias: same block every step -> stay VMEM-resident.
                pl.BlockSpec((NUM_H3, NUM_H2), lambda i: (0, 0)),
                pl.BlockSpec((1, NUM_H2), lambda i: (0, 0)),
            ],
            out_specs=pl.BlockSpec((tb, NUM_H2), lambda i: (i, 0)),
        ),
        compiler_params=pltpu.CompilerParams(
            dimension_semantics=("parallel",),  # shards grid steps across TCs on v7x
        ),
        cost_estimate=cost,
    )(x, wt, b2d)


def init_params(key):
    """Deterministic init matching nn.Linear default: U(-1/sqrt(in), 1/sqrt(in))."""
    kw, kb = jax.random.split(key)
    bound = 1.0 / jnp.sqrt(jnp.float32(NUM_H3))
    # Store weight already transposed: (in, out) = (100, 512)
    wt = jax.random.uniform(kw, (NUM_H3, NUM_H2), jnp.float32, -bound, bound)
    b = jax.random.uniform(kb, (NUM_H2,), jnp.float32, -bound, bound)
    return wt, b


if __name__ == "__main__":
    key = jax.random.PRNGKey(0)
    kx, kp = jax.random.split(key)

    batch = 8  # small demo shape; kernel tiles automatically for large B
    x = jax.random.normal(kx, (batch, NUM_H3), jnp.float32)
    wt, b = init_params(kp)

    y = backward_h3_h2_forward(x, wt, b)
    jax.block_until_ready(y)

    # Reference check in plain JAX
    y_ref = x @ wt + b
    assert y.shape == (batch, NUM_H2)
    assert jnp.allclose(y, y_ref, atol=1e-4, rtol=1e-4)

    print("KERNEL_OK")
</pallas_src>

<mosaic_0001>
module attributes {stable_mosaic.version = 11 : i64} {
  func.func @_linear_kernel(%arg0: i32, %arg1: memref<8x100xf32, #tpu.memory_space<vmem>>, %arg2: memref<100x512xf32, #tpu.memory_space<vmem>>, %arg3: memref<1x512xf32, #tpu.memory_space<vmem>>, %arg4: memref<8x512xf32, #tpu.memory_space<vmem>>) attributes {dimension_semantics = [#tpu.dimension_semantics<parallel>], iteration_bounds = array<i64: 1>, scalar_prefetch = 0 : i64, scratch_operands = 0 : i64, tpu.core_type = #tpu.core_type<tc>, window_params = [{transform_indices = @transform_0, window_bounds = array<i64: 8, 100>}, {pipeline_mode = #tpu.pipeline_mode<synchronous>, transform_indices = @transform_1, window_bounds = array<i64: 100, 512>}, {pipeline_mode = #tpu.pipeline_mode<synchronous>, transform_indices = @transform_2, window_bounds = array<i64: 1, 512>}, {transform_indices = @transform_3, window_bounds = array<i64: 8, 512>}]} {
    %c0 = arith.constant 0 : index
    %c0_0 = arith.constant 0 : index
    %0 = vector.load %arg1[%c0, %c0_0] : memref<8x100xf32, #tpu.memory_space<vmem>>, vector<8x100xf32>
    %c0_1 = arith.constant 0 : index
    %c0_2 = arith.constant 0 : index
    %1 = vector.load %arg2[%c0_1, %c0_2] : memref<100x512xf32, #tpu.memory_space<vmem>>, vector<100x512xf32>
    %cst = arith.constant dense<0.000000e+00> : vector<8x512xf32>
    %2 = tpu.matmul %0, %1, %cst {dimension_numbers = #tpu.dot_dimension_numbers<[1], [0], [0], [1], [0, 0, 1, 1], [], []>} : vector<8x100xf32>, vector<100x512xf32>, vector<8x512xf32> -> vector<8x512xf32>
    %c0_3 = arith.constant 0 : index
    %c0_4 = arith.constant 0 : index
    %3 = vector.load %arg3[%c0_3, %c0_4] : memref<1x512xf32, #tpu.memory_space<vmem>>, vector<1x512xf32>
    %4 = vector.broadcast %3 : vector<1x512xf32> to vector<8x512xf32>
    %5 = arith.addf %2, %4 : vector<8x512xf32>
    %c0_5 = arith.constant 0 : index
    %c0_6 = arith.constant 0 : index
    %6 = vector.load %arg4[%c0_5, %c0_6] : memref<8x512xf32, #tpu.memory_space<vmem>>, vector<8x512xf32>
    tpu.vector_store %arg4[%c0_5, %c0_6], %5 {strides = array<i32>} : memref<8x512xf32, #tpu.memory_space<vmem>>, vector<8x512xf32>,
    return
  }
  func.func @transform_0(%arg0: i32) -> (i32, i32) {
    %c0_i32 = arith.constant 0 : i32
    %c0_i32_0 = arith.constant 0 : i32
    return %arg0, %c0_i32 : i32, i32
  }
  func.func @transform_1(%arg0: i32) -> (i32, i32) {
    %c0_i32 = arith.constant 0 : i32
    %c0_i32_0 = arith.constant 0 : i32
    %c0_i32_1 = arith.constant 0 : i32
    return %c0_i32, %c0_i32_0 : i32, i32
  }
  func.func @transform_2(%arg0: i32) -> (i32, i32) {
    %c0_i32 = arith.constant 0 : i32
    %c0_i32_0 = arith.constant 0 : i32
    %c0_i32_1 = arith.constant 0 : i32
    return %c0_i32, %c0_i32_0 : i32, i32
  }
  func.func @transform_3(%arg0: i32) -> (i32, i32) {
    %c0_i32 = arith.constant 0 : i32
    %c0_i32_0 = arith.constant 0 : i32
    return %arg0, %c0_i32 : i32, i32
  }
}

</mosaic_0001>

<bundles_post_ra>
// kernel: backward_h3_h2_forward.1
= control target key start
LH: loop header
LB: loop body
LE: loop exit
PB: predicated region body
PF: predicated region fallthrough
CT: control target
= control target key end

     0   :  { %8 = vsyncpa [#allocation3], 0  ;;  %s499_s0 = inlined_call_operand.hbm [shape: f32[8,100], index: 0, kind: input, shape index: {}]   ;;  %s500_s1 = inlined_call_operand.hbm [shape: f32[100,512], index: 1, kind: input, shape index: {}]   ;;  %s501_s2 = inlined_call_operand.vmem [shape: f32[1,512], index: 2, kind: input, shape index: {}]   ;;  %s502_s3 = inlined_call_operand.hbm [shape: f32[8,512], index: 3, kind: output, shape index: {}]  }
   0x1   :  { %9 = vsyncpa [#allocation6], 0 }
   0x2   :  { %10 = vsyncpa [#allocation4], 0  ;;  %s427_s12 = smov [#allocation2]   ;;  %s428_s14 = smov [#allocation5]  }
   0x3   :  { %s17_s13 = sshll.u32 %s427_s12, 4  ;;  %s26_s15 = sshll.u32 %s428_s14, 4  ;;  %s18_s13 = int_to_ptr.vmem [resolvable:$true] %s17_s13  ;;  %s453_s15 = int_to_ptr.vmem [resolvable:$true] %s26_s15 }
   0x4   :  { %s355_s18 = scalar_lea.hbm %s499_s0, 128 }
   0x5   :  { %p356_p0 = scmp.ne.s32.totalorder %s499_s0, %s355_s18  ;;  %p359_p1 = scmp.lt.u32.totalorder %s355_s18, %s499_s0 }
   0x7   :  { %p361_p2 = pnand %p359_p1, %p356_p0 }
   0x9   :  { %364 = shalt.err (!%p361_p2)
}
   0xa   :  { %s365_s23 = scalar_lea.vmem %s18_s13, 128  ;;  %p370_p4 = scmp.lt.s32.totalorder %s18_s13, %s18_s13 }
   0xb   :  { %p366_p3 = scmp.ne.s32.totalorder %s18_s13, %s365_s23  ;;  %p371_p5 = scmp.lt.s32.totalorder %s365_s23, %s365_s23 }
   0xd   :  { %p372_p6 = por %p371_p5, %p370_p4 }
   0xf   :  { %p373_p7 = pnand %p372_p6, %p366_p3 }
  0x11   :  { %376 = shalt.err (!%p373_p7)
}
  0x12   :  { %20 = dma.hbm_to_vmem [thread:$0]  %s499_s0, 128, %s18_s13, [#allocation3]  }
  0x13   :  { %s377_s28 = scalar_lea.hbm %s500_s1, 6656 }
  0x14   :  { %p378_p8 = scmp.ne.s32.totalorder %s500_s1, %s377_s28  ;;  %p381_p9 = scmp.lt.u32.totalorder %s377_s28, %s500_s1 }
  0x16   :  { %p383_p10 = pnand %p381_p9, %p378_p8 }
  0x18   :  { %386 = shalt.err (!%p383_p10)
}
  0x19   :  { %s387_s6 = scalar_lea.vmem %s453_s15, 6656  ;;  %p392_p12 = scmp.lt.s32.totalorder %s453_s15, %s453_s15 }
  0x1a   :  { %p388_p11 = scmp.ne.s32.totalorder %s453_s15, %s387_s6  ;;  %p393_p13 = scmp.lt.s32.totalorder %s387_s6, %s387_s6 }
  0x1c   :  { %p394_p0 = por %p393_p13, %p392_p12 }
  0x1e   :  { %p395_p1 = pnand %p394_p0, %p388_p11 }
  0x20   :  { %398 = shalt.err (!%p395_p1)
}
  0x21   :  { %s429_s0 = smov 512   ;;  %s430_s7 = smov 32  }
  0x22   :  { %32 = dma.hbm_to_vmem [thread:$0]  %s500_s1, 6656, %s453_s15, [#allocation6], %s429_s0, %s429_s0, %s430_s7  }
  0x23   :  { %421 = dma.done.wait [#allocation3], 128  }
  0x24   :  { %422 = vsyncadd [#allocation3], 4294967168 }
  0x25   :  { %423 = dma.done.wait [#allocation6], 6656  }
  0x26   :  { %424 = vsyncadd [#allocation6], 4294960640  ;;  %v431_v0 = vmov 0.0   ;;  %v43_v1 = vld [vmem:[#allocation5 + $0x8] sm:$0xff]  ;;  %v45_v3 = vld [vmem:[#allocation5 + $0x18] sm:$0xff]  ;;  %vm120_vm0 = vcmask 1043456  }
  0x27   :  { %197 = vmatprep.mubr.f32.mxu0 %v431_v0  ;;  %268 = vmatprep.mubr.f32.mxu1 %v431_v0  ;;  %v47_v2 = vld [vmem:[#allocation5 + $0x28] sm:$0xff]  ;;  %v49_v5 = vld [vmem:[#allocation5 + $0x38] sm:$0xff]  ;;  %v42_v6 = vld [vmem:[#allocation5] sm:$0xff]  ;;  %vm116_vm1 = vcmask 818176   ;;  %s432_s11 = smov [#allocation7]  }
  0x28   :  { %v301_v4 = vpack.c.bf16 %v47_v2, %v43_v1  ;;  %v46_v7 = vld [vmem:[#allocation5 + $0x20] sm:$0xff]  ;;  %v325_v8 = vpack.c.bf16 %v49_v5, %v45_v3  ;;  %v44_v10 = vld [vmem:[#allocation5 + $0x10] sm:$0xff]  ;;  %v51_v12 = vld [vmem:[#allocation5 + $0x48] sm:$0xff]  ;;  %s285_s12 = sshll.u32 %s432_s11, 4  ;;  %s286_s12 = int_to_ptr.vmem [resolvable:$true] %s285_s12 }
  0x29   :  { %v303_v9 = vpack.c.bf16 %v46_v7, %v42_v6  ;;  %v48_v11 = vld [vmem:[#allocation5 + $0x30] sm:$0xff]  ;;  %v55_v14 = vld [vmem:[#allocation5 + $0x68] sm:$0xff]  ;;  %v53_v15 = vld [vmem:[#allocation5 + $0x58] sm:$0xff]  ;;  %p404_p3 = scmp.lt.s32.totalorder %s286_s12, %s286_s12 }
  0x2a   :  { %302 = vmatprep.subr.bf16.mxu0 %v301_v4  ;;  %v327_v13 = vpack.c.bf16 %v48_v11, %v44_v10  ;;  %v57_v16 = vld [vmem:[#allocation5 + $0x78] sm:$0xff]  ;;  %326 = vmatprep.subr.bf16.mxu1 %v325_v8  ;;  %v305_v17 = vpack.c.bf16 %v55_v14, %v51_v12  ;;  %v50_v19 = vld [vmem:[#allocation5 + $0x40] sm:$0xff]  ;;  %v52_v21 = vld [vmem:[#allocation5 + $0x50] sm:$0xff]  ;;  %v96_v14 = vlaneseq }
  0x2b   :  { %304 = vmatpush1.bf16.msra.mxu0 %v303_v9  ;;  %v329_v18 = vpack.c.bf16 %v57_v16, %v53_v15  ;;  %v54_v20 = vld [vmem:[#allocation5 + $0x60] sm:$0xff]  ;;  %v56_v23 = vld [vmem:[#allocation5 + $0x70] sm:$0xff]  ;;  %v59_v24 = vld [vmem:[#allocation5 + $0x88] sm:$0xff] }
  0x2c   :  { %328 = vmatpush1.bf16.msra.mxu1 %v327_v13  ;;  %v307_v22 = vpack.c.bf16 %v54_v20, %v50_v19  ;;  %v63_v25 = vld [vmem:[#allocation5 + $0xa8] sm:$0xff]  ;;  %306 = vmatprep.subr.bf16.mxu0 %v305_v17  ;;  %v331_v26 = vpack.c.bf16 %v56_v23, %v52_v21  ;;  %v61_v28 = vld [vmem:[#allocation5 + $0x98] sm:$0xff]  ;;  %v58_v30 = vld [vmem:[#allocation5 + $0x80] sm:$0xff]  ;;  %v97_v15 = vshrl.u32 %v96_v14, 7 }
  0x2d   :  { %330 = vmatprep.subr.bf16.mxu1 %v329_v18  ;;  %v309_v27 = vpack.c.bf16 %v63_v25, %v59_v24  ;;  %v65_v29 = vld [vmem:[#allocation5 + $0xb8] sm:$0xff]  ;;  %v62_v32 = vld [vmem:[#allocation5 + $0xa0] sm:$0xff]  ;;  %v60_v33 = vld [vmem:[#allocation5 + $0x90] sm:$0xff] }
  0x2e   :  { %v333_v31 = vpack.c.bf16 %v65_v29, %v61_v28  ;;  %v64_v34 = vld [vmem:[#allocation5 + $0xb0] sm:$0xff]  ;;  %v311_v35 = vpack.c.bf16 %v62_v32, %v58_v30  ;;  %v67_v36 = vld [vmem:[#allocation5 + $0xc8] sm:$0xff]  ;;  %v69_v38 = vld [vmem:[#allocation5 + $0xd8] sm:$0xff]  ;;  %v98_v16 = vsub.s32 0, %v97_v15  ;;  %v106_v18 = vsub.s32 2, %v97_v15 }
  0x2f   :  { %308 = vmatpush1.bf16.msra.mxu0 %v307_v22  ;;  %v71_v37 = vld [vmem:[#allocation5 + $0xe8] sm:$0xff]  ;;  %v335_v39 = vpack.c.bf16 %v64_v34, %v60_v33  ;;  %v73_v41 = vld [vmem:[#allocation5 + $0xf8] sm:$0xff]  ;;  %v66_v42 = vld [vmem:[#allocation5 + $0xc0] sm:$0xff]  ;;  %v102_v19 = vsub.s32 1, %v97_v15  ;;  %v110_v20 = vsub.s32 3, %v97_v15 }
  0x30   :  { %332 = vmatpush1.bf16.msra.mxu1 %v331_v26  ;;  %310 = vmatprep.subr.bf16.mxu0 %v309_v27  ;;  %v313_v40 = vpack.c.bf16 %v71_v37, %v67_v36  ;;  %v70_v43 = vld [vmem:[#allocation5 + $0xe0] sm:$0xff]  ;;  %v337_v44 = vpack.c.bf16 %v73_v41, %v69_v38  ;;  %v68_v45 = vld [vmem:[#allocation5 + $0xd0] sm:$0xff]  ;;  %v75_v47 = vld [vmem:[#allocation5 + $0x108] sm:$0xff] }
  0x31   :  { %334 = vmatprep.subr.bf16.mxu1 %v333_v31  ;;  %v72_v46 = vld [vmem:[#allocation5 + $0xf0] sm:$0xff]  ;;  %v79_v48 = vld [vmem:[#allocation5 + $0x128] sm:$0xff]  ;;  %v77_v49 = vld [vmem:[#allocation5 + $0x118] sm:$0xff]  ;;  %v315_v51 = vpack.c.bf16 %v70_v43, %v66_v42 }
  0x32   :  { %v81_v50 = vld [vmem:[#allocation5 + $0x138] sm:$0xff]  ;;  %v339_v52 = vpack.c.bf16 %v72_v46, %v68_v45  ;;  %v317_v53 = vpack.c.bf16 %v79_v48, %v75_v47  ;;  %v74_v54 = vld [vmem:[#allocation5 + $0x100] sm:$0xff]  ;;  %v76_v56 = vld [vmem:[#allocation5 + $0x110] sm:$0xff] }
  0x33   :  { %312 = vmatpush1.bf16.msra.mxu0 %v311_v35  ;;  %v78_v55 = vld [vmem:[#allocation5 + $0x120] sm:$0xff]  ;;  %v341_v57 = vpack.c.bf16 %v81_v50, %v77_v49  ;;  %v80_v58 = vld [vmem:[#allocation5 + $0x130] sm:$0xff]  ;;  %v83_v59 = vld [vmem:[#allocation5 + $0x148] sm:$0xff] }
  0x34   :  { %336 = vmatpush1.bf16.msra.mxu1 %v335_v39  ;;  %314 = vmatprep.subr.bf16.mxu0 %v313_v40  ;;  %v87_v60 = vld [vmem:[#allocation5 + $0x168] sm:$0xff]  ;;  %v85_v61 = vld [vmem:[#allocation5 + $0x158] sm:$0xff]  ;;  %v319_v63 = vpack.c.bf16 %v78_v55, %v74_v54  ;;  %v343_v0 = vpack.c.bf16 %v80_v58, %v76_v56  ;;  %v82_v2 = vld [vmem:[#allocation5 + $0x140] sm:$0xff] }
  0x35   :  { %338 = vmatprep.subr.bf16.mxu1 %v337_v44  ;;  %v89_v62 = vld [vmem:[#allocation5 + $0x178] sm:$0xff]  ;;  %v321_v1 = vpack.c.bf16 %v87_v60, %v83_v59  ;;  %v86_v3 = vld [vmem:[#allocation5 + $0x160] sm:$0xff]  ;;  %v84_v5 = vld [vmem:[#allocation5 + $0x150] sm:$0xff] }
  0x36   :  { %v345_v4 = vpack.c.bf16 %v89_v62, %v85_v61  ;;  %v88_v6 = vld [vmem:[#allocation5 + $0x170] sm:$0xff]  ;;  %v323_v7 = vpack.c.bf16 %v86_v3, %v82_v2  ;;  %v91_v9 = vld [vmem:[#allocation5 + $0x188] sm:$0xf]  ;;  %v93_v10 = vld [vmem:[#allocation5 + $0x198] sm:$0xf] }
  0x37   :  { %316 = vmatpush1.bf16.msra.mxu0 %v315_v51  ;;  %v347_v8 = vpack.c.bf16 %v88_v6, %v84_v5  ;;  %v90_v11 = vld [vmem:[#allocation5 + $0x180] sm:$0xf]  ;;  %v92_v12 = vld [vmem:[#allocation5 + $0x190] sm:$0xf]  ;;  %v41_v13 = vld [vmem:[#allocation2] sm:$0xff] }
  0x38   :  { %340 = vmatpush1.bf16.msra.mxu1 %v339_v52  ;;  %318 = vmatprep.subr.bf16.mxu0 %v317_v53  ;;  %v94_v17 = vld [vmem:[%s501_s2] sm:$0xf]  ;;  %s399_s2 = scalar_lea.vmem %s286_s12, 512 }
  0x39   :  { %342 = vmatprep.subr.bf16.mxu1 %v341_v57  ;;  %v99_v21 = vrot.slane %v94_v17, %v98_v16  ;;  %v107_v22 = vrot.slane %v94_v17, %v106_v18  ;;  %v103_v23 = vrot.slane %v94_v17, %v102_v19  ;;  %v111_v24 = vrot.slane %v94_v17, %v110_v20  ;;  %p400_p2 = scmp.ne.s32.totalorder %s286_s12, %s399_s2  ;;  %p405_p4 = scmp.lt.s32.totalorder %s399_s2, %s399_s2 }
  0x3b   :  { %320 = vmatpush1.bf16.msra.mxu0 %v319_v63  ;;  %p406_p5 = por %p405_p4, %p404_p3 }
  0x3c   :  { %344 = vmatpush1.bf16.msra.mxu1 %v343_v0  ;;  %322 = vmatprep.subr.bf16.mxu0 %v321_v1 }
  0x3d   :  { %346 = vmatprep.subr.bf16.mxu1 %v345_v4  ;;  %p407_p6 = pnand %p406_p5, %p400_p2 }
  0x3f   :  { %324 = vmatpush1.bf16.msra.mxu0 %v323_v7 }
  0x40   :  { %348 = vmatpush1.bf16.msra.mxu1 %v347_v8  ;;  %295 = vmatprep.subr.msk.mxu0 %vm120_vm0, %v91_v9 }
  0x41   :  { %298 = vmatprep.subr.msk.mxu1 %vm120_vm0, %v93_v10 }
  0x43   :  { %296 = vmatpush1.msk.msra.mxu0 %vm120_vm0, %v90_v11 }
  0x44   :  { %299 = vmatpush1.msk.msra.mxu1 %vm120_vm0, %v92_v12  ;;  %297 = vmatmul.mubr.msk.f32.vlgmr.msra.gmra.mrb[0].mxu0 %vm116_vm1, %v41_v13 }
  0x45   :  { %300 = vmatmul.mubr.msk.f32.vlgmr.msra.gmra.mrb[0].mxu1 %vm116_vm1, %v41_v13 }
 0x117   :  { %v199_v25 = vpop.f32.mrb[0].mxu0 }
 0x118   :  { %v200_v26 = vadd.f32 %v199_v25, %v99_v21  ;;  %v270_v27 = vpop.f32.mrb[0].mxu1  ;;  %v201_v28 = vpop.f32.mrb[1].mxu0 }
 0x119   :  { %v271_v29 = vadd.f32 %v270_v27, %v107_v22  ;;  %v202_v30 = vadd.f32 %v201_v28, %v103_v23  ;;  %v272_v31 = vpop.f32.mrb[1].mxu1 }
 0x11a   :  { %275 = vst [vmem:[#allocation7] sm:$0xff] %v200_v26  ;;  %v273_v32 = vadd.f32 %v272_v31, %v111_v24 }
 0x11b   :  { %277 = vst [vmem:[#allocation7 + $0x10] sm:$0xff] %v271_v29  ;;  %276 = vst [vmem:[#allocation7 + $0x8] sm:$0xff] %v202_v30 }
 0x11c   :  { %278 = vst [vmem:[#allocation7 + $0x18] sm:$0xff] %v273_v32 }
 0x11d   :  { %410 = shalt.err (!%p407_p6)
}
 0x11e   :  { %s411_s15 = scalar_lea.hbm %s502_s3, 512 }
 0x11f   :  { %p412_p7 = scmp.ne.s32.totalorder %s502_s3, %s411_s15  ;;  %p415_p8 = scmp.lt.u32.totalorder %s411_s15, %s502_s3 }
 0x121   :  { %p417_p9 = pnand %p415_p8, %p412_p7 }
 0x123   :  { %420 = shalt.err (!%p417_p9)
}
 0x124   :  { %288 = dma.vmem_to_hbm [thread:$0]  %s286_s12, 512, %s502_s3, [#allocation4]  }
 0x125   :  { %425 = dma.done.wait [#allocation4], 512  }
 0x126   :  { %426 = vsyncadd [#allocation4], 4294966784 }
 0x127   :  { %292 = vsyncpa [#allocation3], 1 }
 0x128   :  { %293 = vsyncpa [#allocation6], 1 }
 0x129   :  { %294 = vsyncpa [#allocation4], 1 }

</bundles_post_ra>
